<compile_context>
chip_gen: v6e
topology: v6e:2x2x1
jax: 0.10.0
libtpu: 0.0.40
codegen_flags: <defaults>
</compile_context>

<pallas_src>
import jax
import jax.numpy as jnp
from jax.experimental import pallas as pl
from jax.experimental.pallas import tpu as pltpu


_LANES = 128
_MAX_TILE_ROWS = 8192              # (8192, 128) f32 = 4 MiB per tensor per buffer
_VMEM_LIMIT_BYTES = 32 * 1024 * 1024  # 3 inputs x 2 bufs x 4 MiB = 24 MiB + headroom


def _round_up(x, m):
    return ((x + m - 1) // m) * m


def _make_mape_kernel(rows, tile_rows):
    """Kernel specialised (at trace time) on the static row count / tile size."""
    need_mask = (rows % tile_rows) != 0  # only the ragged last block needs masking

    def kernel(forecast_ref, target_ref, mask_ref, psum_ref):
        f = forecast_ref[...].astype(jnp.float32)
        t = target_ref[...].astype(jnp.float32)
        m = mask_ref[...].astype(jnp.float32)

        # divide_no_nan(mask, target): divide, then zero NaN and +inf
        # (exactly mirrors the PyTorch reference, incl. -0.0 / -inf behaviour).
        w = m / t
        w = jnp.where(jnp.isnan(w) | (w == jnp.inf), 0.0, w)

        term = jnp.abs((f - t) * w)

        if need_mask:
            # Zero out rows beyond the true element count (clamped-DMA garbage).
            row = (pl.program_id(0) * tile_rows
                   + jax.lax.broadcasted_iota(jnp.int32, term.shape, 0))
            term = jnp.where(row < rows, term, 0.0)

        # Sublane-only (pure VPU) reduction; cross-lane sum happens in the wrapper.
        psum_ref[...] = jnp.sum(term, axis=0, keepdims=True)

    return kernel


def _abs_pct_err_sum_jnp(f, t, m):
    """Plain-jnp partial sum for the < 128-element ragged tail."""
    f = f.astype(jnp.float32)
    t = t.astype(jnp.float32)
    m = m.astype(jnp.float32)
    w = m / t
    w = jnp.where(jnp.isnan(w) | (w == jnp.inf), 0.0, w)
    return jnp.sum(jnp.abs((f - t) * w))


def mape_loss(insample, freq, forecast, target, mask):
    """MAPE loss. forecast/target/mask: (batch, time). insample/freq unused."""
    del insample, freq  # unused by the PyTorch forward as well

    n = forecast.size                      # true element count (mean denominator)
    f_flat = forecast.reshape(-1)          # contiguous flatten: free
    t_flat = target.reshape(-1)
    m_flat = mask.reshape(-1)

    rows = n // _LANES                     # full lane-dense rows handled by the kernel
    n_main = rows * _LANES
    rem = n - n_main                       # < 128 leftover elements -> plain jnp

    total = jnp.float32(0.0)

    if rows > 0:
        if rem == 0:
            f2 = f_flat.reshape(rows, _LANES)
            t2 = t_flat.reshape(rows, _LANES)
            m2 = m_flat.reshape(rows, _LANES)
        else:
            f2 = f_flat[:n_main].reshape(rows, _LANES)
            t2 = t_flat[:n_main].reshape(rows, _LANES)
            m2 = m_flat[:n_main].reshape(rows, _LANES)

        # Tile selection: block rows multiple of 8 (or == rows for tiny inputs),
        # capped at _MAX_TILE_ROWS, and >= 2 grid steps whenever rows > 8 so both
        # v7x TensorCores get work under dimension_semantics=("parallel",).
        if rows <= 8:
            tile_rows = rows
        else:
            tile_rows = min(_MAX_TILE_ROWS, _round_up(pl.cdiv(rows, 2), 8))
        num_tiles = pl.cdiv(rows, tile_rows)

        in_blk = pl.BlockSpec((tile_rows, _LANES), lambda i: (i, 0))
        partials = pl.pallas_call(
            _make_mape_kernel(rows, tile_rows),
            out_shape=jax.ShapeDtypeStruct((num_tiles, _LANES), jnp.float32),
            grid=(num_tiles,),
            in_specs=[in_blk, in_blk, in_blk],
            out_specs=pl.BlockSpec((1, _LANES), lambda i: (i, 0)),
            compiler_params=pltpu.CompilerParams(
                dimension_semantics=("parallel",),
                vmem_limit_bytes=_VMEM_LIMIT_BYTES,
                # Lets XLA fuse the (cheap) slice/reshape producers into the
                # pallas_call operands instead of materializing them in HBM.
                allow_input_fusion=[True, True, True],
            ),
        )(f2, t2, m2)
        total = total + jnp.sum(partials)

    if rem:
        total = total + _abs_pct_err_sum_jnp(
            f_flat[n_main:], t_flat[n_main:], m_flat[n_main:])

    return total / n


def _mape_loss_ref(insample, freq, forecast, target, mask):
    """Pure-JAX reference mirroring the PyTorch module exactly."""
    del insample, freq
    forecast = forecast.astype(jnp.float32)
    target = target.astype(jnp.float32)
    mask = mask.astype(jnp.float32)
    ratio = mask / target
    ratio = jnp.where(jnp.isnan(ratio) | (ratio == jnp.inf), 0.0, ratio)
    return jnp.mean(jnp.abs((forecast - target) * ratio))


if __name__ == "__main__":
    key = jax.random.PRNGKey(0)

    # ---- Case 1: n % 128 == 0 (pure kernel path) with divide_no_nan corners ----
    B, Ti, To, freq = 8, 32, 16, 2            # forecast/target/mask: (8, 16) -> n = 128
    k1, k2, k3, k4 = jax.random.split(key, 4)
    insample = jax.random.normal(k1, (B, Ti), dtype=jnp.float32)
    forecast = jax.random.normal(k2, (B, To), dtype=jnp.float32)
    target = jax.random.normal(k3, (B, To), dtype=jnp.float32)
    mask = (jax.random.uniform(k4, (B, To)) > 0.3).astype(jnp.float32)
    target = target.at[0, 0].set(0.0)          # 1/0 -> +inf -> 0
    mask = mask.at[0, 0].set(1.0)
    target = target.at[1, 3].set(0.0)          # 0/0 -> NaN -> 0
    mask = mask.at[1, 3].set(0.0)

    loss1 = jax.block_until_ready(mape_loss(insample, freq, forecast, target, mask))
    ref1 = _mape_loss_ref(insample, freq, forecast, target, mask)
    assert jnp.allclose(loss1, ref1, rtol=1e-5, atol=1e-6), (loss1, ref1)

    # ---- Case 2: ragged n (multi-tile kernel + <128-elem jnp tail), bf16 inputs ----
    B2, To2 = 16, 100                          # n = 1600 -> 12 kernel rows + 64-elem tail
    k5, k6, k7 = jax.random.split(k4, 3)
    forecast2 = jax.random.normal(k5, (B2, To2), dtype=jnp.float32).astype(jnp.bfloat16)
    target2 = jax.random.normal(k6, (B2, To2), dtype=jnp.float32).astype(jnp.bfloat16)
    mask2 = (jax.random.uniform(k7, (B2, To2)) > 0.3).astype(jnp.bfloat16)

    loss2 = jax.block_until_ready(mape_loss(insample, freq, forecast2, target2, mask2))
    ref2 = _mape_loss_ref(insample, freq, forecast2, target2, mask2)
    assert jnp.allclose(loss2, ref2, rtol=1e-4, atol=1e-5), (loss2, ref2)

    print("KERNEL_OK")
</pallas_src>

<mosaic_0001>
module attributes {stable_mosaic.version = 11 : i64} {
  func.func @kernel(%arg0: i32, %arg1: memref<1x128xf32, #tpu.memory_space<vmem>>, %arg2: memref<1x128xf32, #tpu.memory_space<vmem>>, %arg3: memref<1x128xf32, #tpu.memory_space<vmem>>, %arg4: memref<1x128xf32, #tpu.memory_space<vmem>>) attributes {dimension_semantics = [#tpu.dimension_semantics<parallel>], iteration_bounds = array<i64: 1>, scalar_prefetch = 0 : i64, scratch_operands = 0 : i64, tpu.core_type = #tpu.core_type<tc>, window_params = [{transform_indices = @transform_0, window_bounds = array<i64: 1, 128>}, {transform_indices = @transform_1, window_bounds = array<i64: 1, 128>}, {transform_indices = @transform_2, window_bounds = array<i64: 1, 128>}, {transform_indices = @transform_3, window_bounds = array<i64: 1, 128>}]} {
    %c0 = arith.constant 0 : index
    %c0_0 = arith.constant 0 : index
    %0 = vector.load %arg1[%c0, %c0_0] : memref<1x128xf32, #tpu.memory_space<vmem>>, vector<1x128xf32>
    %c0_1 = arith.constant 0 : index
    %c0_2 = arith.constant 0 : index
    %1 = vector.load %arg2[%c0_1, %c0_2] : memref<1x128xf32, #tpu.memory_space<vmem>>, vector<1x128xf32>
    %c0_3 = arith.constant 0 : index
    %c0_4 = arith.constant 0 : index
    %2 = vector.load %arg3[%c0_3, %c0_4] : memref<1x128xf32, #tpu.memory_space<vmem>>, vector<1x128xf32>
    %3 = arith.divf %2, %1 : vector<1x128xf32>
    %4 = arith.cmpf one, %3, %3 : vector<1x128xf32>
    %cst = arith.constant 0x7F800000 : f32
    %5 = vector.broadcast %cst : f32 to vector<1x128xf32>
    %6 = arith.cmpf oeq, %3, %5 : vector<1x128xf32>
    %7 = arith.ori %4, %6 : vector<1x128xi1>
    %cst_5 = arith.constant 0.000000e+00 : f32
    %8 = vector.broadcast %cst_5 : f32 to vector<1x128xf32>
    %9 = arith.select %7, %8, %3 : vector<1x128xi1>, vector<1x128xf32>
    %10 = arith.subf %0, %1 : vector<1x128xf32>
    %11 = arith.mulf %10, %9 : vector<1x128xf32>
    %12 = math.absf %11 : vector<1x128xf32>
    %cst_6 = arith.constant dense<0.000000e+00> : vector<128xf32>
    %13 = vector.multi_reduction <add>, %12, %cst_6 [0] : vector<1x128xf32> to vector<128xf32>
    %14 = vector.shape_cast %13 : vector<128xf32> to vector<1x128xf32>
    %c0_7 = arith.constant 0 : index
    %c0_8 = arith.constant 0 : index
    %15 = vector.load %arg4[%c0_7, %c0_8] : memref<1x128xf32, #tpu.memory_space<vmem>>, vector<1x128xf32>
    tpu.vector_store %arg4[%c0_7, %c0_8], %14 {strides = array<i32>} : memref<1x128xf32, #tpu.memory_space<vmem>>, vector<1x128xf32>,
    return
  }
  func.func @transform_0(%arg0: i32) -> (i32, i32) {
    %c0_i32 = arith.constant 0 : i32
    %c0_i32_0 = arith.constant 0 : i32
    return %arg0, %c0_i32 : i32, i32
  }
  func.func @transform_1(%arg0: i32) -> (i32, i32) {
    %c0_i32 = arith.constant 0 : i32
    %c0_i32_0 = arith.constant 0 : i32
    return %arg0, %c0_i32 : i32, i32
  }
  func.func @transform_2(%arg0: i32) -> (i32, i32) {
    %c0_i32 = arith.constant 0 : i32
    %c0_i32_0 = arith.constant 0 : i32
    return %arg0, %c0_i32 : i32, i32
  }
  func.func @transform_3(%arg0: i32) -> (i32, i32) {
    %c0_i32 = arith.constant 0 : i32
    %c0_i32_0 = arith.constant 0 : i32
    return %arg0, %c0_i32 : i32, i32
  }
}

</mosaic_0001>

<bundles_post_ra>
// kernel: tpu_custom_call.1
= control target key start
LH: loop header
LB: loop body
LE: loop exit
PB: predicated region body
PF: predicated region fallthrough
CT: control target
= control target key end

     0   :  { %8 = vsyncpa [#allocation3], 0  ;;  %s138_s0 = inlined_call_operand.hbm [shape: f32[1,128], index: 0, kind: input, shape index: {}]   ;;  %s139_s1 = inlined_call_operand.vmem [shape: f32[1,128], index: 1, kind: input, shape index: {}]   ;;  %s140_s2 = inlined_call_operand.vmem [shape: f32[1,128], index: 2, kind: input, shape index: {}]   ;;  %s141_s3 = inlined_call_operand.hbm [shape: f32[1,128], index: 3, kind: output, shape index: {}]  }
   0x1   :  { %9 = vsyncpa [#allocation4], 0  ;;  %s104_s12 = smov [#allocation2]  }
   0x2   :  { %s16_s13 = sshll.u32 %s104_s12, 4  ;;  %s17_s13 = int_to_ptr.vmem [resolvable:$true] %s16_s13 }
   0x3   :  { %s68_s14 = scalar_lea.vmem %s17_s13, 16  ;;  %s72_s15 = scalar_lea.vmem %s17_s13, 32 }
   0x4   :  { %p69_p0 = scmp.ne.s32.totalorder %s17_s13, %s68_s14  ;;  %p73_p1 = scmp.lt.s32.totalorder %s17_s13, %s17_s13 }
   0x5   :  { %p74_p2 = scmp.lt.s32.totalorder %s72_s15, %s68_s14 }
   0x7   :  { %p75_p3 = por %p74_p2, %p73_p1 }
   0x9   :  { %p76_p4 = pnand %p75_p3, %p69_p0 }
   0xb   :  { %79 = shalt.err (!%p76_p4)
}
   0xc   :  { %19 = dma.hbm_to_vmem [thread:$0]  %s138_s0, 16, %s17_s13, [#allocation3]  }
   0xd   :  { %100 = dma.done.wait [#allocation3], 16  }
   0xe   :  { %101 = vsyncadd [#allocation3], 4294967280  ;;  %v28_v0 = vld [vmem:[%s139_s1] sm:$0x1]  ;;  %s105_s0 = smov [#allocation5]  }
   0xf   :  { %58 = vrcp.f32 %v28_v0  ;;  %v29_v1 = vld [vmem:[%s140_s2] sm:$0x1]  ;;  %s47_s22 = sshll.u32 %s105_s0, 4  ;;  %s48_s22 = int_to_ptr.vmem [resolvable:$true] %s47_s22 }
  0x10   :  { %v27_v2 = vld [vmem:[#allocation2] sm:$0x1]  ;;  %s80_s1 = scalar_lea.vmem %s48_s22, 16  ;;  %s84_s23 = scalar_lea.vmem %s48_s22, 32 }
  0x11   :  { %v36_v5 = vsub.f32 %v27_v2, %v28_v0  ;;  %p81_p5 = scmp.ne.s32.totalorder %s48_s22, %s80_s1  ;;  %p85_p6 = scmp.lt.s32.totalorder %s48_s22, %s48_s22 }
  0x12   :  { %p86_p7 = scmp.lt.s32.totalorder %s84_s23, %s80_s1 }
  0x14   :  { %p87_p8 = por %p86_p7, %p85_p6 }
  0x16   :  { %p88_p9 = pnand %p87_p8, %p81_p5 }
  0x1c   :  { %v59_v3 = vpop.eup %58 }
  0x1d   :  { %v31_v4 = vmul.f32 %v59_v3, %v29_v1 }
  0x1f   :  { %vm32_vm0 = vcmp.ne.f32.partialorder %v31_v4, %v31_v4  ;;  %vm33_vm1 = vcmp.eq.f32.partialorder %v31_v4, inf }
  0x20   :  { %vm34_vm2 = vmor %vm32_vm0, %vm33_vm1 }
  0x21   :  { %v35_v6 = vsel %vm34_vm2, 0.0, %v31_v4 }
  0x22   :  { %v37_v7 = vmul.f32 %v36_v5, %v35_v6 }
  0x24   :  { %v38_v8 = vand.u32 2147483647, %v37_v7 }
  0x26   :  { %40 = vst [vmem:[#allocation5] sm:$0x1] %v38_v8 }
  0x27   :  { %91 = shalt.err (!%p88_p9)
}
  0x28   :  { %50 = dma.vmem_to_hbm [thread:$0]  %s48_s22, 16, %s141_s3, [#allocation4]  }
  0x29   :  { %102 = dma.done.wait [#allocation4], 16  }
  0x2a   :  { %103 = vsyncadd [#allocation4], 4294967280 }
  0x2b   :  { %54 = vsyncpa [#allocation3], 1 }
  0x2c   :  { %55 = vsyncpa [#allocation4], 1 }

</bundles_post_ra>
